<compile_context>
chip_gen: v6e
topology: v6e:2x2x1
jax: 0.10.0
libtpu: 0.0.40
codegen_flags: <defaults>
</compile_context>

<pallas_src>
import functools

import jax
import jax.numpy as jnp
from jax import lax
from jax.experimental import pallas as pl
from jax.experimental.pallas import tpu as pltpu

_LANE = 128


# ----------------------------------------------------------------------------
# Pallas kernel: fused conv-as-matmul + BN affine + ReLU
# ----------------------------------------------------------------------------
def _conv_bn_relu_kernel(x_ref, w_ref, s_ref, b_ref, o_ref):
    # x_ref: (tm, K) bf16 im2col patches, w_ref: (K, Coutp) bf16,
    # s/b_ref: (1, Coutp) f32, o_ref: (tm, Coutp) bf16.
    acc = jnp.dot(x_ref[...], w_ref[...], preferred_element_type=jnp.float32)
    y = acc * s_ref[...] + b_ref[...]          # BN affine in f32
    o_ref[...] = jnp.maximum(y, 0.0).astype(o_ref.dtype)


# ----------------------------------------------------------------------------
# VMEM planning / tile sizing (per-generation: v7x has 64 MiB, v5e/v6e 128 MiB)
# ----------------------------------------------------------------------------
def _vmem_plan():
    cap = 64 * 1024 * 1024                      # conservative fallback (v7x)
    try:
        cap = int(pltpu.get_tpu_info().vmem_capacity_bytes)
    except Exception:
        pass
    tile_budget = min(int(cap * 0.4), 48 * 1024 * 1024)
    vmem_limit = min(int(cap * 0.75), 100 * 1024 * 1024)
    return tile_budget, vmem_limit


def _pick_tile_m(M, K, coutp, budget_bytes):
    # Double-buffered resident weight/scale/bias blocks (bf16 / f32).
    resident = 2 * (K * coutp * 2 + 2 * coutp * 4)
    avail = max(budget_bytes - resident, 2 * 1024 * 1024)
    # Double-buffered (tm,K) bf16 input + (tm,Coutp) bf16 output tiles,
    # plus the f32 accumulator living in vregs/VMEM.
    per_row = 2 * (K * 2 + coutp * 2) + coutp * 4
    tm = max(8, min(int(avail // per_row), 1024))
    tm = (tm // 8) * 8
    m_pad8 = ((M + 7) // 8) * 8
    return min(tm, m_pad8)                      # tiny tail layers: one block


# ----------------------------------------------------------------------------
# pallas_call wrapper: tiled over M, pipelined, lane-dense output
# ----------------------------------------------------------------------------
def _conv_bn_relu_matmul(patches, w_mat, scale, bias):
    M, K = patches.shape
    coutp = w_mat.shape[1]
    tile_budget, vmem_limit = _vmem_plan()
    tm = _pick_tile_m(M, K, coutp, tile_budget)
    m_pad = ((M + tm - 1) // tm) * tm
    if m_pad != M:
        patches = jnp.pad(patches, ((0, m_pad - M), (0, 0)))
    grid_m = m_pad // tm

    flops = 2 * m_pad * K * coutp
    bytes_accessed = (m_pad * K + K * coutp + m_pad * coutp) * 2 + 2 * coutp * 4

    out = pl.pallas_call(
        _conv_bn_relu_kernel,
        out_shape=jax.ShapeDtypeStruct((m_pad, coutp), jnp.bfloat16),
        grid=(grid_m,),
        in_specs=[
            pl.BlockSpec((tm, K), lambda i: (i, 0)),
            pl.BlockSpec((K, coutp), lambda i: (0, 0)),
            pl.BlockSpec((1, coutp), lambda i: (0, 0)),
            pl.BlockSpec((1, coutp), lambda i: (0, 0)),
        ],
        out_specs=pl.BlockSpec((tm, coutp), lambda i: (i, 0)),
        compiler_params=pltpu.CompilerParams(
            dimension_semantics=("parallel",),
            vmem_limit_bytes=vmem_limit),
        cost_estimate=pl.CostEstimate(
            flops=flops, transcendentals=0, bytes_accessed=bytes_accessed),
    )(patches, w_mat, scale, bias)
    return out[:M]


# ----------------------------------------------------------------------------
# One Conv2dBlock: 4x4 conv, stride 2, pad 1  ->  BN(eval, folded)  ->  ReLU
# ----------------------------------------------------------------------------
def _conv_block_nhwc(x_nhwc, w_mat, scale, bias, cout):
    N, H, W, Cin = x_nhwc.shape
    Ho, Wo = H // 2, W // 2
    xp = jnp.pad(x_nhwc, ((0, 0), (1, 1), (1, 1), (0, 0)))
    # im2col: gather the 4x4 receptive-field taps with stride 2 (glue, plain JAX).
    taps = [xp[:, kh:kh + 2 * Ho:2, kw:kw + 2 * Wo:2, :]
            for kh in range(4) for kw in range(4)]
    patches = jnp.concatenate(taps, axis=-1)             # (N, Ho, Wo, 16*Cin) bf16
    patches = patches.reshape(N * Ho * Wo, 16 * Cin)     # (M, K)
    out = _conv_bn_relu_matmul(patches, w_mat, scale, bias)   # (M, Coutp) bf16
    return out[:, :cout].reshape(N, Ho, Wo, cout)


# ----------------------------------------------------------------------------
# Full encoder forward (matches Encoder_AttGAN.forward / .encode)
# ----------------------------------------------------------------------------
@functools.partial(jax.jit, static_argnums=(4,))
def encoder_attgan_forward(x_nchw, w_mats, scales, biases, couts):
    z = jnp.transpose(x_nchw, (0, 2, 3, 1)).astype(jnp.bfloat16)  # NCHW -> NHWC
    for w_mat, scale, bias, cout in zip(w_mats, scales, biases, couts):
        z = _conv_block_nhwc(z, w_mat, scale, bias, cout)
    return jnp.transpose(z, (0, 3, 1, 2)).astype(jnp.float32)     # NHWC -> NCHW


# ----------------------------------------------------------------------------
# Deterministic parameter init (synthetic, mirrors module __init__ shapes)
# ----------------------------------------------------------------------------
def init_params(key, channels_img, enc_dim, features_e, enc_layers):
    raw, w_mats, scales, biases, couts = [], [], [], [], []
    n_in = channels_img
    eps = 1e-5
    for i in range(enc_layers):
        n_out = min(features_e * 2 ** i, enc_dim)
        coutp = ((n_out + _LANE - 1) // _LANE) * _LANE
        key, k1, k2, k3, k4, k5 = jax.random.split(key, 6)
        w = jax.random.normal(k1, (n_out, n_in, 4, 4), jnp.float32) * 0.05  # OIHW
        gamma = 1.0 + 0.1 * jax.random.normal(k2, (n_out,), jnp.float32)
        beta = 0.1 * jax.random.normal(k3, (n_out,), jnp.float32)
        rmean = 0.1 * jax.random.normal(k4, (n_out,), jnp.float32)
        rvar = jax.random.uniform(k5, (n_out,), jnp.float32, minval=0.5, maxval=1.5)
        scale = gamma / jnp.sqrt(rvar + eps)
        bias = beta - rmean * scale
        # (Cout, Cin, kh, kw) -> (kh, kw, Cin, Cout) -> (16*Cin, Cout) matches the
        # im2col row ordering (kh outer, kw middle, cin inner).  Zero-pad Cout to a
        # multiple of 128 for lane-dense output stores; padded lanes compute
        # ReLU(0*acc + 0) = 0 and are sliced off in the wrapper.
        w_mat = jnp.transpose(w, (2, 3, 1, 0)).reshape(16 * n_in, n_out)
        w_mat = jnp.pad(w_mat, ((0, 0), (0, coutp - n_out))).astype(jnp.bfloat16)
        scale_p = jnp.pad(scale, (0, coutp - n_out)).reshape(1, coutp)
        bias_p = jnp.pad(bias, (0, coutp - n_out)).reshape(1, coutp)
        raw.append(dict(w=w, scale=scale, bias=bias))
        w_mats.append(w_mat)
        scales.append(scale_p)
        biases.append(bias_p)
        couts.append(n_out)
        n_in = n_out
    return raw, tuple(w_mats), tuple(scales), tuple(biases), tuple(couts)


# ----------------------------------------------------------------------------
# Pure-JAX reference (lax.conv), precision-matched to the bf16 kernel pipeline
# ----------------------------------------------------------------------------
def reference_forward(x_nchw, raw_params):
    z = x_nchw
    for p in raw_params:
        zb = z.astype(jnp.bfloat16).astype(jnp.float32)
        wb = p["w"].astype(jnp.bfloat16).astype(jnp.float32)
        y = lax.conv_general_dilated(
            zb, wb, window_strides=(2, 2), padding=((1, 1), (1, 1)),
            dimension_numbers=("NCHW", "OIHW", "NCHW"),
            precision=lax.Precision.HIGHEST)
        s = p["scale"].reshape(1, -1, 1, 1)
        b = p["bias"].reshape(1, -1, 1, 1)
        y = jnp.maximum(y * s + b, 0.0)
        z = y.astype(jnp.bfloat16).astype(jnp.float32)   # inter-layer bf16
    return z


if __name__ == "__main__":
    # Small shapes consistent with the module:
    #   batch=2, channels_img=4, 16x16 images, features_e=16, enc_dim=64, enc_layers=4
    batch, channels_img, H, W = 2, 4, 16, 16
    enc_dim, features_e, enc_layers = 64, 16, 4

    key = jax.random.PRNGKey(0)
    key, kx = jax.random.split(key)
    x = jax.random.normal(kx, (batch, channels_img, H, W), jnp.float32)

    raw_params, w_mats, scales, biases, couts = init_params(
        key, channels_img, enc_dim, features_e, enc_layers)

    out = encoder_attgan_forward(x, w_mats, scales, biases, couts)
    out = jax.block_until_ready(out)

    ref = jax.block_until_ready(reference_forward(x, raw_params))

    assert out.shape == (batch, min(features_e * 2 ** (enc_layers - 1), enc_dim),
                         H // (2 ** enc_layers), W // (2 ** enc_layers)), out.shape
    assert jnp.allclose(out, ref, atol=1e-2, rtol=1e-2), (
        float(jnp.max(jnp.abs(out - ref))))

    print("KERNEL_OK")
</pallas_src>

<mosaic_0001>
module attributes {stable_mosaic.version = 11 : i64} {
  func.func @_conv_bn_relu_kernel(%arg0: i32, %arg1: memref<128x64xbf16, #tpu.memory_space<vmem>>, %arg2: memref<64x128xbf16, #tpu.memory_space<vmem>>, %arg3: memref<1x128xf32, #tpu.memory_space<vmem>>, %arg4: memref<1x128xf32, #tpu.memory_space<vmem>>, %arg5: memref<128x128xbf16, #tpu.memory_space<vmem>>) attributes {dimension_semantics = [#tpu.dimension_semantics<parallel>], iteration_bounds = array<i64: 1>, scalar_prefetch = 0 : i64, scratch_operands = 0 : i64, tpu.core_type = #tpu.core_type<tc>, window_params = [{transform_indices = @transform_0, window_bounds = array<i64: 128, 64>}, {pipeline_mode = #tpu.pipeline_mode<synchronous>, transform_indices = @transform_1, window_bounds = array<i64: 64, 128>}, {pipeline_mode = #tpu.pipeline_mode<synchronous>, transform_indices = @transform_2, window_bounds = array<i64: 1, 128>}, {pipeline_mode = #tpu.pipeline_mode<synchronous>, transform_indices = @transform_3, window_bounds = array<i64: 1, 128>}, {transform_indices = @transform_4, window_bounds = array<i64: 128, 128>}]} {
    %c0 = arith.constant 0 : index
    %c0_0 = arith.constant 0 : index
    %0 = vector.load %arg1[%c0, %c0_0] : memref<128x64xbf16, #tpu.memory_space<vmem>>, vector<128x64xbf16>
    %c0_1 = arith.constant 0 : index
    %c0_2 = arith.constant 0 : index
    %1 = vector.load %arg2[%c0_1, %c0_2] : memref<64x128xbf16, #tpu.memory_space<vmem>>, vector<64x128xbf16>
    %cst = arith.constant dense<0.000000e+00> : vector<128x128xf32>
    %2 = tpu.matmul %0, %1, %cst {dimension_numbers = #tpu.dot_dimension_numbers<[1], [0], [0], [1], [0, 0, 1, 1], [], []>} : vector<128x64xbf16>, vector<64x128xbf16>, vector<128x128xf32> -> vector<128x128xf32>
    %c0_3 = arith.constant 0 : index
    %c0_4 = arith.constant 0 : index
    %3 = vector.load %arg3[%c0_3, %c0_4] : memref<1x128xf32, #tpu.memory_space<vmem>>, vector<1x128xf32>
    %4 = vector.broadcast %3 : vector<1x128xf32> to vector<128x128xf32>
    %5 = arith.mulf %2, %4 : vector<128x128xf32>
    %c0_5 = arith.constant 0 : index
    %c0_6 = arith.constant 0 : index
    %6 = vector.load %arg4[%c0_5, %c0_6] : memref<1x128xf32, #tpu.memory_space<vmem>>, vector<1x128xf32>
    %7 = vector.broadcast %6 : vector<1x128xf32> to vector<128x128xf32>
    %8 = arith.addf %5, %7 : vector<128x128xf32>
    %cst_7 = arith.constant 0.000000e+00 : f32
    %9 = vector.broadcast %cst_7 : f32 to vector<128x128xf32>
    %10 = arith.maximumf %8, %9 : vector<128x128xf32>
    %11 = arith.truncf %10 : vector<128x128xf32> to vector<128x128xbf16>
    %c0_8 = arith.constant 0 : index
    %c0_9 = arith.constant 0 : index
    %12 = vector.load %arg5[%c0_8, %c0_9] : memref<128x128xbf16, #tpu.memory_space<vmem>>, vector<128x128xbf16>
    tpu.vector_store %arg5[%c0_8, %c0_9], %11 {strides = array<i32>} : memref<128x128xbf16, #tpu.memory_space<vmem>>, vector<128x128xbf16>,
    return
  }
  func.func @transform_0(%arg0: i32) -> (i32, i32) {
    %c0_i32 = arith.constant 0 : i32
    %c0_i32_0 = arith.constant 0 : i32
    return %arg0, %c0_i32 : i32, i32
  }
  func.func @transform_1(%arg0: i32) -> (i32, i32) {
    %c0_i32 = arith.constant 0 : i32
    %c0_i32_0 = arith.constant 0 : i32
    %c0_i32_1 = arith.constant 0 : i32
    return %c0_i32, %c0_i32_0 : i32, i32
  }
  func.func @transform_2(%arg0: i32) -> (i32, i32) {
    %c0_i32 = arith.constant 0 : i32
    %c0_i32_0 = arith.constant 0 : i32
    %c0_i32_1 = arith.constant 0 : i32
    return %c0_i32, %c0_i32_0 : i32, i32
  }
  func.func @transform_3(%arg0: i32) -> (i32, i32) {
    %c0_i32 = arith.constant 0 : i32
    %c0_i32_0 = arith.constant 0 : i32
    %c0_i32_1 = arith.constant 0 : i32
    return %c0_i32, %c0_i32_0 : i32, i32
  }
  func.func @transform_4(%arg0: i32) -> (i32, i32) {
    %c0_i32 = arith.constant 0 : i32
    %c0_i32_0 = arith.constant 0 : i32
    return %arg0, %c0_i32 : i32, i32
  }
}

module attributes {stable_mosaic.version = 11 : i64} {
  func.func @_conv_bn_relu_kernel(%arg0: i32, %arg1: memref<32x256xbf16, #tpu.memory_space<vmem>>, %arg2: memref<256x128xbf16, #tpu.memory_space<vmem>>, %arg3: memref<1x128xf32, #tpu.memory_space<vmem>>, %arg4: memref<1x128xf32, #tpu.memory_space<vmem>>, %arg5: memref<32x128xbf16, #tpu.memory_space<vmem>>) attributes {dimension_semantics = [#tpu.dimension_semantics<parallel>], iteration_bounds = array<i64: 1>, scalar_prefetch = 0 : i64, scratch_operands = 0 : i64, tpu.core_type = #tpu.core_type<tc>, window_params = [{transform_indices = @transform_0, window_bounds = array<i64: 32, 256>}, {pipeline_mode = #tpu.pipeline_mode<synchronous>, transform_indices = @transform_1, window_bounds = array<i64: 256, 128>}, {pipeline_mode = #tpu.pipeline_mode<synchronous>, transform_indices = @transform_2, window_bounds = array<i64: 1, 128>}, {pipeline_mode = #tpu.pipeline_mode<synchronous>, transform_indices = @transform_3, window_bounds = array<i64: 1, 128>}, {transform_indices = @transform_4, window_bounds = array<i64: 32, 128>}]} {
    %c0 = arith.constant 0 : index
    %c0_0 = arith.constant 0 : index
    %0 = vector.load %arg1[%c0, %c0_0] : memref<32x256xbf16, #tpu.memory_space<vmem>>, vector<32x256xbf16>
    %c0_1 = arith.constant 0 : index
    %c0_2 = arith.constant 0 : index
    %1 = vector.load %arg2[%c0_1, %c0_2] : memref<256x128xbf16, #tpu.memory_space<vmem>>, vector<256x128xbf16>
    %cst = arith.constant dense<0.000000e+00> : vector<32x128xf32>
    %2 = tpu.matmul %0, %1, %cst {dimension_numbers = #tpu.dot_dimension_numbers<[1], [0], [0], [1], [0, 0, 1, 1], [], []>} : vector<32x256xbf16>, vector<256x128xbf16>, vector<32x128xf32> -> vector<32x128xf32>
    %c0_3 = arith.constant 0 : index
    %c0_4 = arith.constant 0 : index
    %3 = vector.load %arg3[%c0_3, %c0_4] : memref<1x128xf32, #tpu.memory_space<vmem>>, vector<1x128xf32>
    %4 = vector.broadcast %3 : vector<1x128xf32> to vector<32x128xf32>
    %5 = arith.mulf %2, %4 : vector<32x128xf32>
    %c0_5 = arith.constant 0 : index
    %c0_6 = arith.constant 0 : index
    %6 = vector.load %arg4[%c0_5, %c0_6] : memref<1x128xf32, #tpu.memory_space<vmem>>, vector<1x128xf32>
    %7 = vector.broadcast %6 : vector<1x128xf32> to vector<32x128xf32>
    %8 = arith.addf %5, %7 : vector<32x128xf32>
    %cst_7 = arith.constant 0.000000e+00 : f32
    %9 = vector.broadcast %cst_7 : f32 to vector<32x128xf32>
    %10 = arith.maximumf %8, %9 : vector<32x128xf32>
    %11 = arith.truncf %10 : vector<32x128xf32> to vector<32x128xbf16>
    %c0_8 = arith.constant 0 : index
    %c0_9 = arith.constant 0 : index
    %12 = vector.load %arg5[%c0_8, %c0_9] : memref<32x128xbf16, #tpu.memory_space<vmem>>, vector<32x128xbf16>
    tpu.vector_store %arg5[%c0_8, %c0_9], %11 {strides = array<i32>} : memref<32x128xbf16, #tpu.memory_space<vmem>>, vector<32x128xbf16>,
    return
  }
  func.func @transform_0(%arg0: i32) -> (i32, i32) {
    %c0_i32 = arith.constant 0 : i32
    %c0_i32_0 = arith.constant 0 : i32
    return %arg0, %c0_i32 : i32, i32
  }
  func.func @transform_1(%arg0: i32) -> (i32, i32) {
    %c0_i32 = arith.constant 0 : i32
    %c0_i32_0 = arith.constant 0 : i32
    %c0_i32_1 = arith.constant 0 : i32
    return %c0_i32, %c0_i32_0 : i32, i32
  }
  func.func @transform_2(%arg0: i32) -> (i32, i32) {
    %c0_i32 = arith.constant 0 : i32
    %c0_i32_0 = arith.constant 0 : i32
    %c0_i32_1 = arith.constant 0 : i32
    return %c0_i32, %c0_i32_0 : i32, i32
  }
  func.func @transform_3(%arg0: i32) -> (i32, i32) {
    %c0_i32 = arith.constant 0 : i32
    %c0_i32_0 = arith.constant 0 : i32
    %c0_i32_1 = arith.constant 0 : i32
    return %c0_i32, %c0_i32_0 : i32, i32
  }
  func.func @transform_4(%arg0: i32) -> (i32, i32) {
    %c0_i32 = arith.constant 0 : i32
    %c0_i32_0 = arith.constant 0 : i32
    return %arg0, %c0_i32 : i32, i32
  }
}

module attributes {stable_mosaic.version = 11 : i64} {
  func.func @_conv_bn_relu_kernel(%arg0: i32, %arg1: memref<8x512xbf16, #tpu.memory_space<vmem>>, %arg2: memref<512x128xbf16, #tpu.memory_space<vmem>>, %arg3: memref<1x128xf32, #tpu.memory_space<vmem>>, %arg4: memref<1x128xf32, #tpu.memory_space<vmem>>, %arg5: memref<8x128xbf16, #tpu.memory_space<vmem>>) attributes {dimension_semantics = [#tpu.dimension_semantics<parallel>], iteration_bounds = array<i64: 1>, scalar_prefetch = 0 : i64, scratch_operands = 0 : i64, tpu.core_type = #tpu.core_type<tc>, window_params = [{transform_indices = @transform_0, window_bounds = array<i64: 8, 512>}, {pipeline_mode = #tpu.pipeline_mode<synchronous>, transform_indices = @transform_1, window_bounds = array<i64: 512, 128>}, {pipeline_mode = #tpu.pipeline_mode<synchronous>, transform_indices = @transform_2, window_bounds = array<i64: 1, 128>}, {pipeline_mode = #tpu.pipeline_mode<synchronous>, transform_indices = @transform_3, window_bounds = array<i64: 1, 128>}, {transform_indices = @transform_4, window_bounds = array<i64: 8, 128>}]} {
    %c0 = arith.constant 0 : index
    %c0_0 = arith.constant 0 : index
    %0 = vector.load %arg1[%c0, %c0_0] : memref<8x512xbf16, #tpu.memory_space<vmem>>, vector<8x512xbf16>
    %c0_1 = arith.constant 0 : index
    %c0_2 = arith.constant 0 : index
    %1 = vector.load %arg2[%c0_1, %c0_2] : memref<512x128xbf16, #tpu.memory_space<vmem>>, vector<512x128xbf16>
    %cst = arith.constant dense<0.000000e+00> : vector<8x128xf32>
    %2 = tpu.matmul %0, %1, %cst {dimension_numbers = #tpu.dot_dimension_numbers<[1], [0], [0], [1], [0, 0, 1, 1], [], []>} : vector<8x512xbf16>, vector<512x128xbf16>, vector<8x128xf32> -> vector<8x128xf32>
    %c0_3 = arith.constant 0 : index
    %c0_4 = arith.constant 0 : index
    %3 = vector.load %arg3[%c0_3, %c0_4] : memref<1x128xf32, #tpu.memory_space<vmem>>, vector<1x128xf32>
    %4 = vector.broadcast %3 : vector<1x128xf32> to vector<8x128xf32>
    %5 = arith.mulf %2, %4 : vector<8x128xf32>
    %c0_5 = arith.constant 0 : index
    %c0_6 = arith.constant 0 : index
    %6 = vector.load %arg4[%c0_5, %c0_6] : memref<1x128xf32, #tpu.memory_space<vmem>>, vector<1x128xf32>
    %7 = vector.broadcast %6 : vector<1x128xf32> to vector<8x128xf32>
    %8 = arith.addf %5, %7 : vector<8x128xf32>
    %cst_7 = arith.constant 0.000000e+00 : f32
    %9 = vector.broadcast %cst_7 : f32 to vector<8x128xf32>
    %10 = arith.maximumf %8, %9 : vector<8x128xf32>
    %11 = arith.truncf %10 : vector<8x128xf32> to vector<8x128xbf16>
    %c0_8 = arith.constant 0 : index
    %c0_9 = arith.constant 0 : index
    %12 = vector.load %arg5[%c0_8, %c0_9] : memref<8x128xbf16, #tpu.memory_space<vmem>>, vector<8x128xbf16>
    tpu.vector_store %arg5[%c0_8, %c0_9], %11 {strides = array<i32>} : memref<8x128xbf16, #tpu.memory_space<vmem>>, vector<8x128xbf16>,
    return
  }
  func.func @transform_0(%arg0: i32) -> (i32, i32) {
    %c0_i32 = arith.constant 0 : i32
    %c0_i32_0 = arith.constant 0 : i32
    return %arg0, %c0_i32 : i32, i32
  }
  func.func @transform_1(%arg0: i32) -> (i32, i32) {
    %c0_i32 = arith.constant 0 : i32
    %c0_i32_0 = arith.constant 0 : i32
    %c0_i32_1 = arith.constant 0 : i32
    return %c0_i32, %c0_i32_0 : i32, i32
  }
  func.func @transform_2(%arg0: i32) -> (i32, i32) {
    %c0_i32 = arith.constant 0 : i32
    %c0_i32_0 = arith.constant 0 : i32
    %c0_i32_1 = arith.constant 0 : i32
    return %c0_i32, %c0_i32_0 : i32, i32
  }
  func.func @transform_3(%arg0: i32) -> (i32, i32) {
    %c0_i32 = arith.constant 0 : i32
    %c0_i32_0 = arith.constant 0 : i32
    %c0_i32_1 = arith.constant 0 : i32
    return %c0_i32, %c0_i32_0 : i32, i32
  }
  func.func @transform_4(%arg0: i32) -> (i32, i32) {
    %c0_i32 = arith.constant 0 : i32
    %c0_i32_0 = arith.constant 0 : i32
    return %arg0, %c0_i32 : i32, i32
  }
}

module attributes {stable_mosaic.version = 11 : i64} {
  func.func @_conv_bn_relu_kernel(%arg0: i32, %arg1: memref<8x1024xbf16, #tpu.memory_space<vmem>>, %arg2: memref<1024x128xbf16, #tpu.memory_space<vmem>>, %arg3: memref<1x128xf32, #tpu.memory_space<vmem>>, %arg4: memref<1x128xf32, #tpu.memory_space<vmem>>, %arg5: memref<8x128xbf16, #tpu.memory_space<vmem>>) attributes {dimension_semantics = [#tpu.dimension_semantics<parallel>], iteration_bounds = array<i64: 1>, scalar_prefetch = 0 : i64, scratch_operands = 0 : i64, tpu.core_type = #tpu.core_type<tc>, window_params = [{transform_indices = @transform_0, window_bounds = array<i64: 8, 1024>}, {pipeline_mode = #tpu.pipeline_mode<synchronous>, transform_indices = @transform_1, window_bounds = array<i64: 1024, 128>}, {pipeline_mode = #tpu.pipeline_mode<synchronous>, transform_indices = @transform_2, window_bounds = array<i64: 1, 128>}, {pipeline_mode = #tpu.pipeline_mode<synchronous>, transform_indices = @transform_3, window_bounds = array<i64: 1, 128>}, {transform_indices = @transform_4, window_bounds = array<i64: 8, 128>}]} {
    %c0 = arith.constant 0 : index
    %c0_0 = arith.constant 0 : index
    %0 = vector.load %arg1[%c0, %c0_0] : memref<8x1024xbf16, #tpu.memory_space<vmem>>, vector<8x1024xbf16>
    %c0_1 = arith.constant 0 : index
    %c0_2 = arith.constant 0 : index
    %1 = vector.load %arg2[%c0_1, %c0_2] : memref<1024x128xbf16, #tpu.memory_space<vmem>>, vector<1024x128xbf16>
    %cst = arith.constant dense<0.000000e+00> : vector<8x128xf32>
    %2 = tpu.matmul %0, %1, %cst {dimension_numbers = #tpu.dot_dimension_numbers<[1], [0], [0], [1], [0, 0, 1, 1], [], []>} : vector<8x1024xbf16>, vector<1024x128xbf16>, vector<8x128xf32> -> vector<8x128xf32>
    %c0_3 = arith.constant 0 : index
    %c0_4 = arith.constant 0 : index
    %3 = vector.load %arg3[%c0_3, %c0_4] : memref<1x128xf32, #tpu.memory_space<vmem>>, vector<1x128xf32>
    %4 = vector.broadcast %3 : vector<1x128xf32> to vector<8x128xf32>
    %5 = arith.mulf %2, %4 : vector<8x128xf32>
    %c0_5 = arith.constant 0 : index
    %c0_6 = arith.constant 0 : index
    %6 = vector.load %arg4[%c0_5, %c0_6] : memref<1x128xf32, #tpu.memory_space<vmem>>, vector<1x128xf32>
    %7 = vector.broadcast %6 : vector<1x128xf32> to vector<8x128xf32>
    %8 = arith.addf %5, %7 : vector<8x128xf32>
    %cst_7 = arith.constant 0.000000e+00 : f32
    %9 = vector.broadcast %cst_7 : f32 to vector<8x128xf32>
    %10 = arith.maximumf %8, %9 : vector<8x128xf32>
    %11 = arith.truncf %10 : vector<8x128xf32> to vector<8x128xbf16>
    %c0_8 = arith.constant 0 : index
    %c0_9 = arith.constant 0 : index
    %12 = vector.load %arg5[%c0_8, %c0_9] : memref<8x128xbf16, #tpu.memory_space<vmem>>, vector<8x128xbf16>
    tpu.vector_store %arg5[%c0_8, %c0_9], %11 {strides = array<i32>} : memref<8x128xbf16, #tpu.memory_space<vmem>>, vector<8x128xbf16>,
    return
  }
  func.func @transform_0(%arg0: i32) -> (i32, i32) {
    %c0_i32 = arith.constant 0 : i32
    %c0_i32_0 = arith.constant 0 : i32
    return %arg0, %c0_i32 : i32, i32
  }
  func.func @transform_1(%arg0: i32) -> (i32, i32) {
    %c0_i32 = arith.constant 0 : i32
    %c0_i32_0 = arith.constant 0 : i32
    %c0_i32_1 = arith.constant 0 : i32
    return %c0_i32, %c0_i32_0 : i32, i32
  }
  func.func @transform_2(%arg0: i32) -> (i32, i32) {
    %c0_i32 = arith.constant 0 : i32
    %c0_i32_0 = arith.constant 0 : i32
    %c0_i32_1 = arith.constant 0 : i32
    return %c0_i32, %c0_i32_0 : i32, i32
  }
  func.func @transform_3(%arg0: i32) -> (i32, i32) {
    %c0_i32 = arith.constant 0 : i32
    %c0_i32_0 = arith.constant 0 : i32
    %c0_i32_1 = arith.constant 0 : i32
    return %c0_i32, %c0_i32_0 : i32, i32
  }
  func.func @transform_4(%arg0: i32) -> (i32, i32) {
    %c0_i32 = arith.constant 0 : i32
    %c0_i32_0 = arith.constant 0 : i32
    return %arg0, %c0_i32 : i32, i32
  }
}

</mosaic_0001>

<bundles_post_ra>
// kernel: encoder_attgan_forward.4
= control target key start
LH: loop header
LB: loop body
LE: loop exit
PB: predicated region body
PF: predicated region fallthrough
CT: control target
= control target key end

     0   :  { %vm106_vm0 = vcmask 523264   ;;  %s648_s1 = inlined_call_operand.vmem [shape: bf16[64,128], index: 1, kind: input, shape index: {}]   ;;  %s649_s0 = inlined_call_operand.vmem [shape: bf16[128,64], index: 0, kind: input, shape index: {}]   ;;  %s650_s2 = inlined_call_operand.vmem [shape: f32[1,128], index: 2, kind: input, shape index: {}]   ;;  %s651_s3 = inlined_call_operand.vmem [shape: f32[1,128], index: 3, kind: input, shape index: {}]   ;;  %s652_s4 = inlined_call_operand.vmem [shape: bf16[128,128], index: 4, kind: output, shape index: {}]  }
   0x1   :  { %v519_v0 = vld [vmem:[%s648_s1 + $0x18] sm:$0xff]   ;;  %v520_v1 = vld [vmem:[%s648_s1 + $0x10] sm:$0xff]   ;;  %v521_v2 = vld [vmem:[%s648_s1 + $0x8] sm:$0xff]  }
   0x2   :  { %487 = vmatprep.subr.bf16.mxu0 %v519_v0  ;;  %511 = vmatprep.subr.bf16.mxu1 %v519_v0  ;;  %v523_v3 = vld [vmem:[%s649_s0] sm:$0xff]   ;;  %v525_v6 = vld [vmem:[%s649_s0 + $0x8] sm:$0xff]   ;;  %v527_v8 = vld [vmem:[%s649_s0 + $0x10] sm:$0xff]  }
   0x3   :  { %488 = vmatpush3.bf16.msra.mxu0 %v519_v0  ;;  %515 = vmatpush3.bf16.msra.mxu1 %v519_v0  ;;  %v524_v4 = vld [vmem:[%s649_s0 + $0x20] sm:$0xff]   ;;  %v526_v7 = vld [vmem:[%s649_s0 + $0x28] sm:$0xff]   ;;  %v528_v9 = vld [vmem:[%s649_s0 + $0x30] sm:$0xff]  }
   0x4   :  { %489 = vmatprep.subr.bf16.mxu0 %v520_v1  ;;  %512 = vmatprep.subr.bf16.mxu1 %v520_v1  ;;  %v522_v5 = vld [vmem:[%s648_s1] sm:$0xff]   ;;  %v529_v10 = vld [vmem:[%s649_s0 + $0x18] sm:$0xff]  }
   0x5   :  { %495 = vmatprep.mubr.msk.bf16.mxu0 %vm106_vm0, %v523_v3  ;;  %503 = vmatprep.mubr.msk.bf16.mxu1 %vm106_vm0, %v524_v4  ;;  %v530_v11 = vld [vmem:[%s649_s0 + $0x38] sm:$0xff]   ;;  %v603_v12 = vld [vmem:[%s650_s2] ss:$0 sm:$0xff] }
   0x6   :  { %v395_v17 = vld [vmem:[%s651_s3] ss:$0 sm:$0xff] }
   0x7   :  { %490 = vmatpush3.bf16.msra.mxu0 %v520_v1  ;;  %516 = vmatpush3.bf16.msra.mxu1 %v520_v1 }
   0x8   :  { %491 = vmatprep.subr.bf16.mxu0 %v521_v2  ;;  %513 = vmatprep.subr.bf16.mxu1 %v521_v2 }
   0xb   :  { %492 = vmatpush3.bf16.msra.mxu0 %v521_v2  ;;  %517 = vmatpush3.bf16.msra.mxu1 %v521_v2 }
   0xc   :  { %493 = vmatprep.subr.bf16.mxu0 %v522_v5  ;;  %514 = vmatprep.subr.bf16.mxu1 %v522_v5 }
   0xf   :  { %494 = vmatpush3.bf16.msra.mxu0 %v522_v5  ;;  %518 = vmatpush3.bf16.msra.mxu1 %v522_v5 }
  0x12   :  { %496 = vmatmul.mubr.msk.bf16.vlgmr.msra.gmra.mxu0 %vm106_vm0, %v525_v6  ;;  %504 = vmatmul.mubr.msk.bf16.vlgmr.msra.gmra.mxu1 %vm106_vm0, %v526_v7 }
  0x13   :  { %499 = vmatprep.mubr.msk.bf16.mxu0 %vm106_vm0, %v527_v8  ;;  %507 = vmatprep.mubr.msk.bf16.mxu1 %vm106_vm0, %v528_v9 }
  0x1a   :  { %500 = vmatmul.mubr.msk.bf16.gmra.mxu0 %vm106_vm0, %v529_v10  ;;  %508 = vmatmul.mubr.msk.bf16.gmra.mxu1 %vm106_vm0, %v530_v11 }
  0xd2   :  { %v497_v13 = vpop.f32.mrf.mxu0  ;;  %v505_v14 = vpop.f32.mrf.mxu1 }
  0xd3   :  { %v237_v15 = vmul.f32 %v497_v13, %v603_v12  ;;  %v245_v16 = vmul.f32 %v505_v14, %v603_v12 }
  0xd4   :  { %v165_v18 = vpop.f32.mrf.mxu0  ;;  %v197_v19 = vpop.f32.mrf.mxu1 }
  0xd5   :  { %v235_v20 = vmul.f32 %v603_v12, %v165_v18  ;;  %v243_v21 = vmul.f32 %v603_v12, %v197_v19  ;;  %v260_v24 = vadd.f32 %v395_v17, %v237_v15  ;;  %v268_v25 = vadd.f32 %v395_v17, %v245_v16 }
  0xd6   :  { %v498_v22 = vpop.f32.mrf.mxu0  ;;  %v506_v23 = vpop.f32.mrf.mxu1 }
  0xd7   :  { %v238_v26 = vmul.f32 %v498_v22, %v603_v12  ;;  %v246_v27 = vmul.f32 %v506_v23, %v603_v12  ;;  %v258_v30 = vadd.f32 %v395_v17, %v235_v20  ;;  %v266_v31 = vadd.f32 %v395_v17, %v243_v21 }
  0xd8   :  { %v168_v28 = vpop.f32.mrf.mxu0  ;;  %v200_v29 = vpop.f32.mrf.mxu1  ;;  %v276_v38 = vmax.f32 %v260_v24, 0.0  ;;  %v284_v39 = vmax.f32 %v268_v25, 0.0 }
  0xd9   :  { %v236_v32 = vmul.f32 %v603_v12, %v168_v28  ;;  %v244_v33 = vmul.f32 %v603_v12, %v200_v29  ;;  %v261_v34 = vadd.f32 %v395_v17, %v238_v26  ;;  %v269_v35 = vadd.f32 %v395_v17, %v246_v27 }
  0xda   :  { %v501_v36 = vpop.f32.mrf.mxu0  ;;  %v509_v37 = vpop.f32.mrf.mxu1  ;;  %v274_v48 = vmax.f32 %v258_v30, 0.0  ;;  %v282_v49 = vmax.f32 %v266_v31, 0.0 }
  0xdb   :  { %v259_v40 = vadd.f32 %v395_v17, %v236_v32  ;;  %v267_v41 = vadd.f32 %v395_v17, %v244_v33  ;;  %v277_v42 = vmax.f32 %v261_v34, 0.0  ;;  %v285_v43 = vmax.f32 %v269_v35, 0.0 }
  0xdc   :  { %v241_v44 = vmul.f32 %v501_v36, %v603_v12  ;;  %v249_v45 = vmul.f32 %v509_v37, %v603_v12  ;;  %v181_v46 = vpop.f32.mrf.mxu0  ;;  %v213_v47 = vpop.f32.mrf.mxu1 }
  0xdd   :  { %v275_v50 = vmax.f32 %v259_v40, 0.0  ;;  %v283_v51 = vmax.f32 %v267_v41, 0.0  ;;  %v436_v52 = vpack.c.bf16 %v277_v42, %v276_v38  ;;  %v456_v53 = vpack.c.bf16 %v285_v43, %v284_v39 }
  0xde   :  { %v239_v54 = vmul.f32 %v603_v12, %v181_v46  ;;  %v247_v55 = vmul.f32 %v603_v12, %v213_v47  ;;  %v502_v56 = vpop.f32.mrf.mxu0  ;;  %v510_v57 = vpop.f32.mrf.mxu1  ;;  %v264_v60 = vadd.f32 %v395_v17, %v241_v44  ;;  %v272_v61 = vadd.f32 %v395_v17, %v249_v45 }
  0xdf   :  { %v431_v58 = vpack.c.bf16 %v275_v50, %v274_v48  ;;  %v451_v59 = vpack.c.bf16 %v283_v51, %v282_v49  ;;  %468 = vst [vmem:[%s652_s4 + $0x8] sm:$0xff] %v436_v52   ;;  %472 = vst [vmem:[%s652_s4 + $0x28] sm:$0xff] %v456_v53   ;;  %v242_v62 = vmul.f32 %v502_v56, %v603_v12 }
  0xe0   :  { %v250_v63 = vmul.f32 %v510_v57, %v603_v12  ;;  %v184_v0 = vpop.f32.mrf.mxu0  ;;  %v216_v1 = vpop.f32.mrf.mxu1  ;;  %v262_v2 = vadd.f32 %v395_v17, %v239_v54  ;;  %v270_v3 = vadd.f32 %v395_v17, %v247_v55  ;;  %v280_v10 = vmax.f32 %v264_v60, 0.0 }
  0xe1   :  { %432 = vst [vmem:[%s652_s4] sm:$0xff] %v431_v58   ;;  %471 = vst [vmem:[%s652_s4 + $0x20] sm:$0xff] %v451_v59   ;;  %v240_v4 = vmul.f32 %v603_v12, %v184_v0  ;;  %v248_v5 = vmul.f32 %v603_v12, %v216_v1  ;;  %v265_v6 = vadd.f32 %v395_v17, %v242_v62  ;;  %v288_v11 = vmax.f32 %v272_v61, 0.0 }
  0xe2   :  { %v273_v7 = vadd.f32 %v395_v17, %v250_v63  ;;  %v278_v15 = vmax.f32 %v262_v2, 0.0  ;;  %v286_v16 = vmax.f32 %v270_v3, 0.0 }
  0xe3   :  { %v263_v8 = vadd.f32 %v395_v17, %v240_v4  ;;  %v271_v9 = vadd.f32 %v395_v17, %v248_v5  ;;  %v281_v13 = vmax.f32 %v265_v6, 0.0 }
  0xe4   :  { %v289_v14 = vmax.f32 %v273_v7, 0.0 }
  0xe5   :  { %v279_v18 = vmax.f32 %v263_v8, 0.0  ;;  %v287_v19 = vmax.f32 %v271_v9, 0.0  ;;  %v446_v20 = vpack.c.bf16 %v281_v13, %v280_v10 }
  0xe6   :  { %v466_v21 = vpack.c.bf16 %v289_v14, %v288_v11 }
  0xe7   :  { %v441_v22 = vpack.c.bf16 %v279_v18, %v278_v15  ;;  %v461_v23 = vpack.c.bf16 %v287_v19, %v286_v16  ;;  %470 = vst [vmem:[%s652_s4 + $0x18] sm:$0xff] %v446_v20  }
  0xe8   :  { %474 = vst [vmem:[%s652_s4 + $0x38] sm:$0xff] %v466_v21  }
  0xe9   :  { %469 = vst [vmem:[%s652_s4 + $0x10] sm:$0xff] %v441_v22   ;;  %473 = vst [vmem:[%s652_s4 + $0x30] sm:$0xff] %v461_v23  }

// kernel: encoder_attgan_forward.5
= control target key start
LH: loop header
LB: loop body
LE: loop exit
PB: predicated region body
PF: predicated region fallthrough
CT: control target
= control target key end

     0   :  { %s473_s1 = inlined_call_operand.vmem [shape: bf16[256,128], index: 1, kind: input, shape index: {}]   ;;  %s474_s0 = inlined_call_operand.vmem [shape: bf16[32,256], index: 0, kind: input, shape index: {}]   ;;  %s475_s2 = inlined_call_operand.vmem [shape: f32[1,128], index: 2, kind: input, shape index: {}]   ;;  %s476_s3 = inlined_call_operand.vmem [shape: f32[1,128], index: 3, kind: input, shape index: {}]   ;;  %s477_s4 = inlined_call_operand.vmem [shape: bf16[32,128], index: 4, kind: output, shape index: {}]  }
   0x1   :  { %v354_v0 = vld [vmem:[%s473_s1 + $0x78] sm:$0xff]   ;;  %v356_v2 = vld [vmem:[%s473_s1 + $0x70] sm:$0xff]   ;;  %v358_v4 = vld [vmem:[%s473_s1 + $0x68] sm:$0xff]  }
   0x2   :  { %v355_v1 = vld [vmem:[%s473_s1 + $0x38] sm:$0xff]   ;;  %310 = vmatprep.subr.bf16.mxu0 %v354_v0  ;;  %338 = vmatprep.subr.bf16.mxu1 %v354_v0  ;;  %v357_v3 = vld [vmem:[%s473_s1 + $0x30] sm:$0xff]   ;;  %v359_v5 = vld [vmem:[%s473_s1 + $0x28] sm:$0xff]  }
   0x3   :  { %311 = vmatpush3.bf16.msra.mxu0 %v355_v1  ;;  %346 = vmatpush3.bf16.msra.mxu1 %v355_v1  ;;  %v360_v6 = vld [vmem:[%s473_s1 + $0x60] sm:$0xff]   ;;  %v362_v8 = vld [vmem:[%s473_s1 + $0x58] sm:$0xff]   ;;  %v364_v10 = vld [vmem:[%s473_s1 + $0x50] sm:$0xff]  }
   0x4   :  { %312 = vmatprep.subr.bf16.mxu0 %v356_v2  ;;  %339 = vmatprep.subr.bf16.mxu1 %v356_v2  ;;  %v361_v7 = vld [vmem:[%s473_s1 + $0x20] sm:$0xff]   ;;  %v363_v9 = vld [vmem:[%s473_s1 + $0x18] sm:$0xff]   ;;  %v365_v13 = vld [vmem:[%s473_s1 + $0x10] sm:$0xff]  }
   0x5   :  { %v372_v11 = vld [vmem:[%s474_s0 + $0x4] ss:$8 sps:$4 sm:$0xff]   ;;  %v375_v12 = vld [vmem:[%s474_s0 + $0x14] ss:$8 sps:$4 sm:$0xff]   ;;  %v370_v18 = vld [vmem:[%s474_s0] ss:$8 sps:$4 sm:$0xff]  }
   0x6   :  { %v366_v14 = vld [vmem:[%s473_s1 + $0x48] sm:$0xff]   ;;  %202 = vmatprep.mubr.bf16.mxu0 %v372_v11  ;;  %210 = vmatprep.mubr.bf16.mxu1 %v375_v12  ;;  %v368_v16 = vld [vmem:[%s473_s1 + $0x40] sm:$0xff]   ;;  %v373_v19 = vld [vmem:[%s474_s0 + $0x10] ss:$8 sps:$4 sm:$0xff]  }
   0x7   :  { %313 = vmatpush3.bf16.msra.mxu0 %v357_v3  ;;  %347 = vmatpush3.bf16.msra.mxu1 %v357_v3  ;;  %v367_v15 = vld [vmem:[%s473_s1 + $0x8] sm:$0xff]   ;;  %v369_v17 = vld [vmem:[%s473_s1] sm:$0xff]  }
   0x8   :  { %314 = vmatprep.subr.bf16.mxu0 %v358_v4  ;;  %340 = vmatprep.subr.bf16.mxu1 %v358_v4  ;;  %v289_v23 = vld [vmem:[%s475_s2] ss:$0 sm:$0xff] }
   0x9   :  { %v290_v31 = vld [vmem:[%s476_s3] ss:$0 sm:$0xff] }
   0xb   :  { %315 = vmatpush3.bf16.msra.mxu0 %v359_v5  ;;  %348 = vmatpush3.bf16.msra.mxu1 %v359_v5 }
   0xc   :  { %316 = vmatprep.subr.bf16.mxu0 %v360_v6  ;;  %341 = vmatprep.subr.bf16.mxu1 %v360_v6 }
   0xf   :  { %317 = vmatpush3.bf16.msra.mxu0 %v361_v7  ;;  %349 = vmatpush3.bf16.msra.mxu1 %v361_v7 }
  0x10   :  { %318 = vmatprep.subr.bf16.mxu0 %v362_v8  ;;  %342 = vmatprep.subr.bf16.mxu1 %v362_v8 }
  0x13   :  { %319 = vmatpush3.bf16.msra.mxu0 %v363_v9  ;;  %350 = vmatpush3.bf16.msra.mxu1 %v363_v9 }
  0x14   :  { %320 = vmatprep.subr.bf16.mxu0 %v364_v10  ;;  %343 = vmatprep.subr.bf16.mxu1 %v364_v10 }
  0x17   :  { %321 = vmatpush3.bf16.msra.mxu0 %v365_v13  ;;  %351 = vmatpush3.bf16.msra.mxu1 %v365_v13 }
  0x18   :  { %322 = vmatprep.subr.bf16.mxu0 %v366_v14  ;;  %344 = vmatprep.subr.bf16.mxu1 %v366_v14 }
  0x1b   :  { %323 = vmatpush3.bf16.msra.mxu0 %v367_v15  ;;  %352 = vmatpush3.bf16.msra.mxu1 %v367_v15 }
  0x1c   :  { %324 = vmatprep.subr.bf16.mxu0 %v368_v16  ;;  %345 = vmatprep.subr.bf16.mxu1 %v368_v16 }
  0x1f   :  { %325 = vmatpush3.bf16.msra.mxu0 %v369_v17  ;;  %353 = vmatpush3.bf16.msra.mxu1 %v369_v17 }
  0x22   :  { %203 = vmatmul.mubr.bf16.vlgmr.msra.gmra.mxu0 %v370_v18  ;;  %211 = vmatmul.mubr.bf16.vlgmr.msra.gmra.mxu1 %v373_v19 }
  0xe2   :  { %v326_v20 = vpop.f32.mrf.mxu0  ;;  %v332_v21 = vpop.f32.mrf.mxu1 }
  0xe4   :  { %v327_v22 = vpop.f32.mrf.mxu0  ;;  %v333_v24 = vpop.f32.mrf.mxu1 }
  0xe5   :  { %v328_v25 = vadd.f32 %v327_v22, %v326_v20  ;;  %v334_v26 = vadd.f32 %v333_v24, %v332_v21 }
  0xe6   :  { %v329_v27 = vpop.f32.mrf.mxu0  ;;  %v335_v28 = vpop.f32.mrf.mxu1 }
  0xe7   :  { %v226_v29 = vmul.f32 %v328_v25, %v289_v23  ;;  %v228_v30 = vmul.f32 %v334_v26, %v289_v23 }
  0xe8   :  { %v330_v32 = vpop.f32.mrf.mxu0  ;;  %v336_v33 = vpop.f32.mrf.mxu1 }
  0xe9   :  { %v331_v34 = vadd.f32 %v330_v32, %v329_v27  ;;  %v337_v35 = vadd.f32 %v336_v33, %v335_v28  ;;  %v237_v36 = vadd.f32 %v290_v31, %v226_v29  ;;  %v239_v37 = vadd.f32 %v290_v31, %v228_v30 }
  0xeb   :  { %v227_v38 = vmul.f32 %v331_v34, %v289_v23  ;;  %v229_v39 = vmul.f32 %v337_v35, %v289_v23  ;;  %v241_v42 = vmax.f32 %v237_v36, 0.0  ;;  %v243_v43 = vmax.f32 %v239_v37, 0.0 }
  0xed   :  { %v238_v40 = vadd.f32 %v290_v31, %v227_v38  ;;  %v240_v41 = vadd.f32 %v290_v31, %v229_v39 }
  0xef   :  { %v242_v44 = vmax.f32 %v238_v40, 0.0  ;;  %v244_v45 = vmax.f32 %v240_v41, 0.0 }
  0xf1   :  { %v302_v46 = vpack.c.bf16 %v242_v44, %v241_v42  ;;  %v307_v47 = vpack.c.bf16 %v244_v45, %v243_v43 }
  0xf3   :  { %303 = vst [vmem:[%s477_s4] sm:$0xff] %v302_v46   ;;  %309 = vst [vmem:[%s477_s4 + $0x8] sm:$0xff] %v307_v47  }

// kernel: encoder_attgan_forward.6
= control target key start
LH: loop header
LB: loop body
LE: loop exit
PB: predicated region body
PF: predicated region fallthrough
CT: control target
= control target key end

     0   :  { %s647_s1 = inlined_call_operand.vmem [shape: bf16[512,128], index: 1, kind: input, shape index: {}]   ;;  %s648_s0 = inlined_call_operand.vmem [shape: bf16[8,512], index: 0, kind: input, shape index: {}]   ;;  %s649_s2 = inlined_call_operand.vmem [shape: f32[1,128], index: 2, kind: input, shape index: {}]   ;;  %s650_s3 = inlined_call_operand.vmem [shape: f32[1,128], index: 3, kind: input, shape index: {}]   ;;  %s651_s4 = inlined_call_operand.vmem [shape: bf16[8,128], index: 4, kind: output, shape index: {}]  }
   0x1   :  { %v475_v0 = vld [vmem:[%s647_s1 + $0x78] sm:$0xff]   ;;  %v479_v4 = vld [vmem:[%s647_s1 + $0x70] sm:$0xff]   ;;  %v483_v8 = vld [vmem:[%s647_s1 + $0x68] sm:$0xff]  }
   0x2   :  { %v476_v1 = vld [vmem:[%s647_s1 + $0xf8] sm:$0xff]   ;;  %431 = vmatprep.subr.bf16.mxu0 %v475_v0  ;;  %v480_v5 = vld [vmem:[%s647_s1 + $0xf0] sm:$0xff]   ;;  %v484_v9 = vld [vmem:[%s647_s1 + $0xe8] sm:$0xff]  }
   0x3   :  { %v477_v2 = vld [vmem:[%s647_s1 + $0x38] sm:$0xff]   ;;  %453 = vmatprep.subr.bf16.mxu1 %v476_v1  ;;  %v481_v6 = vld [vmem:[%s647_s1 + $0x30] sm:$0xff]   ;;  %v485_v10 = vld [vmem:[%s647_s1 + $0x28] sm:$0xff]  }
   0x4   :  { %v478_v3 = vld [vmem:[%s647_s1 + $0xb8] sm:$0xff]   ;;  %432 = vmatpush3.bf16.msra.mxu0 %v477_v2  ;;  %v482_v7 = vld [vmem:[%s647_s1 + $0xb0] sm:$0xff]   ;;  %v486_v11 = vld [vmem:[%s647_s1 + $0xa8] sm:$0xff]  }
   0x5   :  { %454 = vmatpush3.bf16.msra.mxu1 %v478_v3  ;;  %433 = vmatprep.subr.bf16.mxu0 %v479_v4  ;;  %v487_v12 = vld [vmem:[%s647_s1 + $0x60] sm:$0xff]   ;;  %v491_v16 = vld [vmem:[%s647_s1 + $0x58] sm:$0xff]   ;;  %v495_v20 = vld [vmem:[%s647_s1 + $0x50] sm:$0xff]  }
   0x6   :  { %455 = vmatprep.subr.bf16.mxu1 %v480_v5  ;;  %v488_v13 = vld [vmem:[%s647_s1 + $0xe0] sm:$0xff]   ;;  %v492_v17 = vld [vmem:[%s647_s1 + $0xd8] sm:$0xff]   ;;  %v496_v21 = vld [vmem:[%s647_s1 + $0xd0] sm:$0xff]  }
   0x7   :  { %v489_v14 = vld [vmem:[%s647_s1 + $0x20] sm:$0xff]   ;;  %v493_v18 = vld [vmem:[%s647_s1 + $0x18] sm:$0xff]   ;;  %v497_v22 = vld [vmem:[%s647_s1 + $0x10] sm:$0xff]  }
   0x8   :  { %434 = vmatpush3.bf16.msra.mxu0 %v481_v6  ;;  %v490_v15 = vld [vmem:[%s647_s1 + $0xa0] sm:$0xff]   ;;  %v494_v19 = vld [vmem:[%s647_s1 + $0x98] sm:$0xff]   ;;  %v498_v23 = vld [vmem:[%s647_s1 + $0x90] sm:$0xff]  }
   0x9   :  { %456 = vmatpush3.bf16.msra.mxu1 %v482_v7  ;;  %435 = vmatprep.subr.bf16.mxu0 %v483_v8  ;;  %v499_v24 = vld [vmem:[%s647_s1 + $0x48] sm:$0xff]   ;;  %v503_v28 = vld [vmem:[%s647_s1 + $0x40] sm:$0xff]  }
   0xa   :  { %457 = vmatprep.subr.bf16.mxu1 %v484_v9  ;;  %v500_v25 = vld [vmem:[%s647_s1 + $0xc8] sm:$0xff]   ;;  %v504_v29 = vld [vmem:[%s647_s1 + $0xc0] sm:$0xff]  }
   0xb   :  { %v501_v26 = vld [vmem:[%s647_s1 + $0x8] sm:$0xff]   ;;  %v505_v30 = vld [vmem:[%s647_s1] sm:$0xff]  }
   0xc   :  { %436 = vmatpush3.bf16.msra.mxu0 %v485_v10  ;;  %v502_v27 = vld [vmem:[%s647_s1 + $0x88] sm:$0xff]   ;;  %v506_v31 = vld [vmem:[%s647_s1 + $0x80] sm:$0xff]  }
   0xd   :  { %458 = vmatpush3.bf16.msra.mxu1 %v486_v11  ;;  %437 = vmatprep.subr.bf16.mxu0 %v487_v12  ;;  %v18_v32 = vld [vmem:[%s648_s0] sm:$0xff]  ;;  %v19_v33 = vld [vmem:[%s648_s0 + $0x8] sm:$0xff] }
   0xe   :  { %459 = vmatprep.subr.bf16.mxu1 %v488_v13  ;;  %v393_v34 = vcombine.low %v18_v32, %v18_v32  ;;  %v394_v35 = vcombine.high %v18_v32, %v18_v32  ;;  %v395_v36 = vcombine.low %v19_v33, %v19_v33  ;;  %v396_v37 = vcombine.high %v19_v33, %v19_v33  ;;  %v429_v44 = vld [vmem:[%s649_s2] ss:$0 sm:$0xff] }
   0xf   :  { %v430_v48 = vld [vmem:[%s650_s3] ss:$0 sm:$0xff] }
  0x10   :  { %438 = vmatpush3.bf16.msra.mxu0 %v489_v14  ;;  %322 = vmatprep.mubr.bf16.mxu0 %v394_v35 }
  0x11   :  { %460 = vmatpush3.bf16.msra.mxu1 %v490_v15  ;;  %439 = vmatprep.subr.bf16.mxu0 %v491_v16 }
  0x12   :  { %461 = vmatprep.subr.bf16.mxu1 %v492_v17  ;;  %362 = vmatprep.mubr.bf16.mxu1 %v396_v37 }
  0x14   :  { %440 = vmatpush3.bf16.msra.mxu0 %v493_v18 }
  0x15   :  { %462 = vmatpush3.bf16.msra.mxu1 %v494_v19  ;;  %441 = vmatprep.subr.bf16.mxu0 %v495_v20 }
  0x16   :  { %463 = vmatprep.subr.bf16.mxu1 %v496_v21 }
  0x18   :  { %442 = vmatpush3.bf16.msra.mxu0 %v497_v22 }
  0x19   :  { %464 = vmatpush3.bf16.msra.mxu1 %v498_v23  ;;  %443 = vmatprep.subr.bf16.mxu0 %v499_v24 }
  0x1a   :  { %465 = vmatprep.subr.bf16.mxu1 %v500_v25 }
  0x1c   :  { %444 = vmatpush3.bf16.msra.mxu0 %v501_v26 }
  0x1d   :  { %466 = vmatpush3.bf16.msra.mxu1 %v502_v27  ;;  %445 = vmatprep.subr.bf16.mxu0 %v503_v28 }
  0x1e   :  { %467 = vmatprep.subr.bf16.mxu1 %v504_v29 }
  0x20   :  { %446 = vmatpush3.bf16.msra.mxu0 %v505_v30 }
  0x21   :  { %468 = vmatpush3.bf16.msra.mxu1 %v506_v31 }
  0x23   :  { %323 = vmatmul.mubr.bf16.vlgmr.msra.gmra.mxu0 %v393_v34 }
  0x24   :  { %363 = vmatmul.mubr.bf16.vlgmr.msra.gmra.mxu1 %v395_v36 }
  0xe3   :  { %v447_v38 = vpop.f32.mrf.mxu0 }
  0xe4   :  { %v469_v39 = vpop.f32.mrf.mxu1 }
  0xe5   :  { %v448_v40 = vpop.f32.mrf.mxu0 }
  0xe6   :  { %v470_v41 = vpop.f32.mrf.mxu1  ;;  %v449_v42 = vadd.f32 %v448_v40, %v447_v38 }
  0xe7   :  { %v471_v43 = vadd.f32 %v470_v41, %v469_v39  ;;  %v450_v45 = vpop.f32.mrf.mxu0 }
  0xe8   :  { %v472_v46 = vpop.f32.mrf.mxu1 }
  0xe9   :  { %v365_v47 = vadd.f32 %v471_v43, %v449_v42  ;;  %v451_v49 = vpop.f32.mrf.mxu0 }
  0xea   :  { %v473_v50 = vpop.f32.mrf.mxu1 }
  0xeb   :  { %v377_v51 = vmul.f32 %v429_v44, %v365_v47 }
  0xed   :  { %v385_v52 = vadd.f32 %v430_v48, %v377_v51 }
  0xef   :  { %v386_v53 = vmax.f32 %v385_v52, 0.0 }
  0xf1   :  { %v387_v54 = vpack.c.bf16 %v386_v53, %v386_v53 }
  0xf3   :  { %388 = vst [vmem:[%s651_s4] sm:$0xf] %v387_v54 }

// kernel: encoder_attgan_forward.7
= control target key start
LH: loop header
LB: loop body
LE: loop exit
PB: predicated region body
PF: predicated region fallthrough
CT: control target
= control target key end

     0   :  { %s1217_s1 = inlined_call_operand.vmem [shape: bf16[1024,128], index: 1, kind: input, shape index: {}]   ;;  %s1218_s0 = inlined_call_operand.vmem [shape: bf16[8,1024], index: 0, kind: input, shape index: {}]   ;;  %s1219_s2 = inlined_call_operand.vmem [shape: f32[1,128], index: 2, kind: input, shape index: {}]   ;;  %s1220_s3 = inlined_call_operand.vmem [shape: f32[1,128], index: 3, kind: input, shape index: {}]   ;;  %s1221_s4 = inlined_call_operand.vmem [shape: bf16[8,128], index: 4, kind: output, shape index: {}]  }
   0x1   :  { %v907_v0 = vld [vmem:[%s1217_s1 + $0x78] sm:$0xff]   ;;  %v911_v4 = vld [vmem:[%s1217_s1 + $0x70] sm:$0xff]   ;;  %v915_v8 = vld [vmem:[%s1217_s1 + $0x68] sm:$0xff]  }
   0x2   :  { %v908_v1 = vld [vmem:[%s1217_s1 + $0xf8] sm:$0xff]   ;;  %819 = vmatprep.subr.bf16.mxu0 %v907_v0  ;;  %v912_v5 = vld [vmem:[%s1217_s1 + $0xf0] sm:$0xff]   ;;  %v916_v9 = vld [vmem:[%s1217_s1 + $0xe8] sm:$0xff]  }
   0x3   :  { %v909_v2 = vld [vmem:[%s1217_s1 + $0x38] sm:$0xff]   ;;  %841 = vmatprep.subr.bf16.mxu1 %v908_v1  ;;  %v913_v6 = vld [vmem:[%s1217_s1 + $0x30] sm:$0xff]   ;;  %v917_v10 = vld [vmem:[%s1217_s1 + $0x28] sm:$0xff]  }
   0x4   :  { %v910_v3 = vld [vmem:[%s1217_s1 + $0xb8] sm:$0xff]   ;;  %820 = vmatpush3.bf16.msra.mxu0 %v909_v2  ;;  %v914_v7 = vld [vmem:[%s1217_s1 + $0xb0] sm:$0xff]   ;;  %v918_v11 = vld [vmem:[%s1217_s1 + $0xa8] sm:$0xff]  }
   0x5   :  { %842 = vmatpush3.bf16.msra.mxu1 %v910_v3  ;;  %821 = vmatprep.subr.bf16.mxu0 %v911_v4  ;;  %v919_v12 = vld [vmem:[%s1217_s1 + $0x60] sm:$0xff]   ;;  %v923_v16 = vld [vmem:[%s1217_s1 + $0x58] sm:$0xff]   ;;  %v927_v20 = vld [vmem:[%s1217_s1 + $0x50] sm:$0xff]  }
   0x6   :  { %843 = vmatprep.subr.bf16.mxu1 %v912_v5  ;;  %v920_v13 = vld [vmem:[%s1217_s1 + $0xe0] sm:$0xff]   ;;  %v924_v17 = vld [vmem:[%s1217_s1 + $0xd8] sm:$0xff]   ;;  %v928_v21 = vld [vmem:[%s1217_s1 + $0xd0] sm:$0xff]  }
   0x7   :  { %v921_v14 = vld [vmem:[%s1217_s1 + $0x20] sm:$0xff]   ;;  %v925_v18 = vld [vmem:[%s1217_s1 + $0x18] sm:$0xff]   ;;  %v929_v22 = vld [vmem:[%s1217_s1 + $0x10] sm:$0xff]  }
   0x8   :  { %822 = vmatpush3.bf16.msra.mxu0 %v913_v6  ;;  %v922_v15 = vld [vmem:[%s1217_s1 + $0xa0] sm:$0xff]   ;;  %v926_v19 = vld [vmem:[%s1217_s1 + $0x98] sm:$0xff]   ;;  %v930_v23 = vld [vmem:[%s1217_s1 + $0x90] sm:$0xff]  }
   0x9   :  { %844 = vmatpush3.bf16.msra.mxu1 %v914_v7  ;;  %823 = vmatprep.subr.bf16.mxu0 %v915_v8  ;;  %v931_v24 = vld [vmem:[%s1217_s1 + $0x48] sm:$0xff]   ;;  %v935_v28 = vld [vmem:[%s1217_s1 + $0x40] sm:$0xff]   ;;  %v943_v38 = vld [vmem:[%s1217_s1 + $0x178] sm:$0xff]  }
   0xa   :  { %845 = vmatprep.subr.bf16.mxu1 %v916_v9  ;;  %v932_v25 = vld [vmem:[%s1217_s1 + $0xc8] sm:$0xff]   ;;  %v936_v29 = vld [vmem:[%s1217_s1 + $0xc0] sm:$0xff]   ;;  %v944_v39 = vld [vmem:[%s1217_s1 + $0x1f8] sm:$0xff]  }
   0xb   :  { %v933_v26 = vld [vmem:[%s1217_s1 + $0x8] sm:$0xff]   ;;  %v937_v30 = vld [vmem:[%s1217_s1] sm:$0xff]   ;;  %v945_v40 = vld [vmem:[%s1217_s1 + $0x138] sm:$0xff]  }
   0xc   :  { %824 = vmatpush3.bf16.msra.mxu0 %v917_v10  ;;  %v934_v27 = vld [vmem:[%s1217_s1 + $0x88] sm:$0xff]   ;;  %v938_v31 = vld [vmem:[%s1217_s1 + $0x80] sm:$0xff]   ;;  %v946_v41 = vld [vmem:[%s1217_s1 + $0x1b8] sm:$0xff]  }
   0xd   :  { %846 = vmatpush3.bf16.msra.mxu1 %v918_v11  ;;  %825 = vmatprep.subr.bf16.mxu0 %v919_v12  ;;  %v18_v32 = vld [vmem:[%s1218_s0] sm:$0xff]  ;;  %v19_v33 = vld [vmem:[%s1218_s0 + $0x8] sm:$0xff]  ;;  %v947_v42 = vld [vmem:[%s1217_s1 + $0x170] sm:$0xff]  }
   0xe   :  { %847 = vmatprep.subr.bf16.mxu1 %v920_v13  ;;  %v745_v34 = vcombine.low %v18_v32, %v18_v32  ;;  %v746_v35 = vcombine.high %v18_v32, %v18_v32  ;;  %v747_v36 = vcombine.low %v19_v33, %v19_v33  ;;  %v748_v37 = vcombine.high %v19_v33, %v19_v33  ;;  %v948_v43 = vld [vmem:[%s1217_s1 + $0x1f0] sm:$0xff]   ;;  %v951_v46 = vld [vmem:[%s1217_s1 + $0x168] sm:$0xff]   ;;  %v955_v50 = vld [vmem:[%s1217_s1 + $0x160] sm:$0xff]  }
   0xf   :  { %v949_v44 = vld [vmem:[%s1217_s1 + $0x130] sm:$0xff]   ;;  %v952_v47 = vld [vmem:[%s1217_s1 + $0x1e8] sm:$0xff]   ;;  %v956_v51 = vld [vmem:[%s1217_s1 + $0x1e0] sm:$0xff]  }
  0x10   :  { %826 = vmatpush3.bf16.msra.mxu0 %v921_v14  ;;  %594 = vmatprep.mubr.bf16.mxu0 %v746_v35  ;;  %v950_v45 = vld [vmem:[%s1217_s1 + $0x1b0] sm:$0xff]   ;;  %v953_v48 = vld [vmem:[%s1217_s1 + $0x128] sm:$0xff]   ;;  %v957_v52 = vld [vmem:[%s1217_s1 + $0x120] sm:$0xff]  }
  0x11   :  { %848 = vmatpush3.bf16.msra.mxu1 %v922_v15  ;;  %827 = vmatprep.subr.bf16.mxu0 %v923_v16  ;;  %v954_v49 = vld [vmem:[%s1217_s1 + $0x1a8] sm:$0xff]   ;;  %v958_v53 = vld [vmem:[%s1217_s1 + $0x1a0] sm:$0xff]   ;;  %v959_v54 = vld [vmem:[%s1217_s1 + $0x158] sm:$0xff]  }
  0x12   :  { %849 = vmatprep.subr.bf16.mxu1 %v924_v17  ;;  %634 = vmatprep.mubr.bf16.mxu1 %v748_v37  ;;  %v960_v55 = vld [vmem:[%s1217_s1 + $0x1d8] sm:$0xff]   ;;  %v963_v58 = vld [vmem:[%s1217_s1 + $0x150] sm:$0xff]   ;;  %v967_v62 = vld [vmem:[%s1217_s1 + $0x148] sm:$0xff]  }
  0x13   :  { %v961_v56 = vld [vmem:[%s1217_s1 + $0x118] sm:$0xff]   ;;  %v964_v59 = vld [vmem:[%s1217_s1 + $0x1d0] sm:$0xff]   ;;  %v968_v63 = vld [vmem:[%s1217_s1 + $0x1c8] sm:$0xff]  }
  0x14   :  { %828 = vmatpush3.bf16.msra.mxu0 %v925_v18  ;;  %v962_v57 = vld [vmem:[%s1217_s1 + $0x198] sm:$0xff]   ;;  %v965_v60 = vld [vmem:[%s1217_s1 + $0x110] sm:$0xff]   ;;  %v969_v0 = vld [vmem:[%s1217_s1 + $0x108] sm:$0xff]  }
  0x15   :  { %850 = vmatpush3.bf16.msra.mxu1 %v926_v19  ;;  %829 = vmatprep.subr.bf16.mxu0 %v927_v20  ;;  %v966_v61 = vld [vmem:[%s1217_s1 + $0x190] sm:$0xff]   ;;  %v970_v1 = vld [vmem:[%s1217_s1 + $0x188] sm:$0xff]   ;;  %v971_v2 = vld [vmem:[%s1217_s1 + $0x140] sm:$0xff]  }
  0x16   :  { %851 = vmatprep.subr.bf16.mxu1 %v928_v21  ;;  %v972_v3 = vld [vmem:[%s1217_s1 + $0x1c0] sm:$0xff]   ;;  %v20_v6 = vld [vmem:[%s1218_s0 + $0x10] sm:$0xff]  ;;  %v21_v9 = vld [vmem:[%s1218_s0 + $0x18] sm:$0xff] }
  0x17   :  { %v973_v4 = vld [vmem:[%s1217_s1 + $0x100] sm:$0xff]   ;;  %v749_v7 = vcombine.low %v20_v6, %v20_v6  ;;  %v750_v8 = vcombine.high %v20_v6, %v20_v6  ;;  %v751_v10 = vcombine.low %v21_v9, %v21_v9  ;;  %v752_v11 = vcombine.high %v21_v9, %v21_v9 }
  0x18   :  { %830 = vmatpush3.bf16.msra.mxu0 %v929_v22  ;;  %v974_v5 = vld [vmem:[%s1217_s1 + $0x180] sm:$0xff]  }
  0x19   :  { %852 = vmatpush3.bf16.msra.mxu1 %v930_v23  ;;  %831 = vmatprep.subr.bf16.mxu0 %v931_v24  ;;  %v817_v32 = vld [vmem:[%s1219_s2] ss:$0 sm:$0xff] }
  0x1a   :  { %853 = vmatprep.subr.bf16.mxu1 %v932_v25 }
  0x1c   :  { %832 = vmatpush3.bf16.msra.mxu0 %v933_v26 }
  0x1d   :  { %854 = vmatpush3.bf16.msra.mxu1 %v934_v27  ;;  %833 = vmatprep.subr.bf16.mxu0 %v935_v28 }
  0x1e   :  { %855 = vmatprep.subr.bf16.mxu1 %v936_v29 }
  0x20   :  { %834 = vmatpush3.bf16.msra.mxu0 %v937_v30 }
  0x21   :  { %856 = vmatpush3.bf16.msra.mxu1 %v938_v31  ;;  %863 = vmatprep.subr.bf16.mxu0 %v943_v38 }
  0x22   :  { %885 = vmatprep.subr.bf16.mxu1 %v944_v39 }
  0x23   :  { %595 = vmatmul.mubr.bf16.vlgmr.msra.gmra.mxu0 %v745_v34 }
  0x24   :  { %635 = vmatmul.mubr.bf16.vlgmr.msra.gmra.mxu1 %v747_v36  ;;  %864 = vmatpush3.bf16.msra.mxu0 %v945_v40  ;;  %v818_v36 = vld [vmem:[%s1220_s3] ss:$0 sm:$0xff] }
  0x25   :  { %886 = vmatpush3.bf16.msra.mxu1 %v946_v41  ;;  %865 = vmatprep.subr.bf16.mxu0 %v947_v42 }
  0x26   :  { %887 = vmatprep.subr.bf16.mxu1 %v948_v43  ;;  %674 = vmatprep.mubr.bf16.mxu0 %v750_v8 }
  0x27   :  { %714 = vmatprep.mubr.bf16.mxu1 %v752_v11 }
  0x28   :  { %866 = vmatpush3.bf16.msra.mxu0 %v949_v44 }
  0x29   :  { %888 = vmatpush3.bf16.msra.mxu1 %v950_v45  ;;  %867 = vmatprep.subr.bf16.mxu0 %v951_v46 }
  0x2a   :  { %889 = vmatprep.subr.bf16.mxu1 %v952_v47 }
  0x2c   :  { %868 = vmatpush3.bf16.msra.mxu0 %v953_v48 }
  0x2d   :  { %890 = vmatpush3.bf16.msra.mxu1 %v954_v49  ;;  %869 = vmatprep.subr.bf16.mxu0 %v955_v50 }
  0x2e   :  { %891 = vmatprep.subr.bf16.mxu1 %v956_v51 }
  0x30   :  { %870 = vmatpush3.bf16.msra.mxu0 %v957_v52 }
  0x31   :  { %892 = vmatpush3.bf16.msra.mxu1 %v958_v53  ;;  %871 = vmatprep.subr.bf16.mxu0 %v959_v54 }
  0x32   :  { %893 = vmatprep.subr.bf16.mxu1 %v960_v55 }
  0x34   :  { %872 = vmatpush3.bf16.msra.mxu0 %v961_v56 }
  0x35   :  { %894 = vmatpush3.bf16.msra.mxu1 %v962_v57  ;;  %873 = vmatprep.subr.bf16.mxu0 %v963_v58 }
  0x36   :  { %895 = vmatprep.subr.bf16.mxu1 %v964_v59 }
  0x38   :  { %874 = vmatpush3.bf16.msra.mxu0 %v965_v60 }
  0x39   :  { %896 = vmatpush3.bf16.msra.mxu1 %v966_v61  ;;  %875 = vmatprep.subr.bf16.mxu0 %v967_v62 }
  0x3a   :  { %897 = vmatprep.subr.bf16.mxu1 %v968_v63 }
  0x3c   :  { %876 = vmatpush3.bf16.msra.mxu0 %v969_v0 }
  0x3d   :  { %898 = vmatpush3.bf16.msra.mxu1 %v970_v1  ;;  %877 = vmatprep.subr.bf16.mxu0 %v971_v2 }
  0x3e   :  { %899 = vmatprep.subr.bf16.mxu1 %v972_v3 }
  0x40   :  { %878 = vmatpush3.bf16.msra.mxu0 %v973_v4 }
  0x41   :  { %900 = vmatpush3.bf16.msra.mxu1 %v974_v5 }
  0x43   :  { %675 = vmatmul.mubr.bf16.vlgmr.msra.gmra.mxu0 %v749_v7 }
  0x44   :  { %715 = vmatmul.mubr.bf16.vlgmr.msra.gmra.mxu1 %v751_v10 }
  0xe3   :  { %v835_v12 = vpop.f32.mrf.mxu0 }
  0xe4   :  { %v857_v13 = vpop.f32.mrf.mxu1 }
  0xe5   :  { %v836_v14 = vpop.f32.mrf.mxu0 }
  0xe6   :  { %v858_v15 = vpop.f32.mrf.mxu1  ;;  %v837_v20 = vadd.f32 %v836_v14, %v835_v12 }
  0xe7   :  { %v838_v16 = vpop.f32.mrf.mxu0  ;;  %v859_v21 = vadd.f32 %v858_v15, %v857_v13 }
  0xe8   :  { %v860_v17 = vpop.f32.mrf.mxu1 }
  0xe9   :  { %v839_v18 = vpop.f32.mrf.mxu0  ;;  %v637_v26 = vadd.f32 %v859_v21, %v837_v20 }
  0xea   :  { %v861_v19 = vpop.f32.mrf.mxu1 }
 0x103   :  { %v879_v22 = vpop.f32.mrf.mxu0 }
 0x104   :  { %v901_v23 = vpop.f32.mrf.mxu1 }
 0x105   :  { %v880_v24 = vpop.f32.mrf.mxu0 }
 0x106   :  { %v902_v25 = vpop.f32.mrf.mxu1  ;;  %v881_v27 = vadd.f32 %v880_v24, %v879_v22 }
 0x107   :  { %v882_v28 = vpop.f32.mrf.mxu0  ;;  %v903_v31 = vadd.f32 %v902_v25, %v901_v23 }
 0x108   :  { %v904_v29 = vpop.f32.mrf.mxu1  ;;  %v677_v30 = vadd.f32 %v881_v27, %v637_v26 }
 0x109   :  { %v883_v33 = vpop.f32.mrf.mxu0 }
 0x10a   :  { %v905_v34 = vpop.f32.mrf.mxu1  ;;  %v717_v35 = vadd.f32 %v903_v31, %v677_v30 }
 0x10c   :  { %v729_v37 = vmul.f32 %v817_v32, %v717_v35 }
 0x10e   :  { %v737_v38 = vadd.f32 %v818_v36, %v729_v37 }
 0x110   :  { %v738_v39 = vmax.f32 %v737_v38, 0.0 }
 0x112   :  { %v739_v40 = vpack.c.bf16 %v738_v39, %v738_v39 }
 0x114   :  { %740 = vst [vmem:[%s1221_s4] sm:$0xf] %v739_v40 }

</bundles_post_ra>
